<compile_context>
chip_gen: v6e
topology: v6e:2x2x1
jax: 0.10.0
libtpu: 0.0.40
codegen_flags: <defaults>
</compile_context>

<pallas_src>
import jax
import jax.numpy as jnp
from jax.experimental import pallas as pl
from jax.experimental.pallas import tpu as pltpu

_LN_EPS = 1e-5  # PyTorch nn.LayerNorm default


# ---------------------------------------------------------------------------
# Kernel
# ---------------------------------------------------------------------------
def _msm_kernel(h_ref,                                    # (tile, D) packed input
                w1_ref, ln1_ref, mavg_ref,                # branch layer 1 (block-diag)
                w2_ref, wgh_ref, wgs_ref, bvec_ref,       # branch layer 2 + gates
                ws1_ref, lns_ref, ws2_ref, bs2_ref,       # shared projection
                out_ref):                                 # (tile, D+shared_dim) packed
    h = h_ref[...]                                        # float32

    # ---- per-branch specific path, fused via block-diagonal weights --------
    # z = cat_m(h_m @ W1_m) + cat_m(b1_m)     (tile, 3H)
    z = jnp.dot(h, w1_ref[...], preferred_element_type=jnp.float32) + ln1_ref[0:1, :]
    # per-branch (segment) LayerNorm via block-averaging matmul (exact)
    mu = jnp.dot(z, mavg_ref[...], preferred_element_type=jnp.float32)
    zc = z - mu
    var = jnp.dot(zc * zc, mavg_ref[...], preferred_element_type=jnp.float32)
    zn = zc * jax.lax.rsqrt(var + _LN_EPS) * ln1_ref[1:2, :] + ln1_ref[2:3, :]
    r = jnp.maximum(zn, 0.0)                              # ReLU (Dropout = identity)
    # s_raw = cat_m(tanh(r_m @ W2_m + b2_m))   (tile, D)
    s_raw = jnp.tanh(jnp.dot(r, w2_ref[...], preferred_element_type=jnp.float32)
                     + bvec_ref[0:1, :])
    # gate = sigmoid(cat_m(h_m @ Wgh_m + s_raw_m @ Wgs_m + bg_m))
    gl = (jnp.dot(h, wgh_ref[...], preferred_element_type=jnp.float32)
          + jnp.dot(s_raw, wgs_ref[...], preferred_element_type=jnp.float32)
          + bvec_ref[1:2, :])
    gate = 1.0 / (1.0 + jnp.exp(-gl))                     # exp on EUP
    branch_out = h + gate * (s_raw - h)                   # (tile, D)

    # ---- shared projection: single matmul on the packed slab ---------------
    zs = jnp.dot(h, ws1_ref[...], preferred_element_type=jnp.float32) + lns_ref[0:1, :]
    mus = jnp.mean(zs, axis=-1, keepdims=True)
    zsc = zs - mus
    vs = jnp.mean(zsc * zsc, axis=-1, keepdims=True)
    rs = jnp.maximum(zsc * jax.lax.rsqrt(vs + _LN_EPS) * lns_ref[1:2, :]
                     + lns_ref[2:3, :], 0.0)
    shared = (jnp.dot(rs, ws2_ref[...], preferred_element_type=jnp.float32)
              + bs2_ref[...])                             # (tile, shared_dim)

    # ---- one dense, lane-packed store --------------------------------------
    out_ref[...] = jnp.concatenate([branch_out, shared],
                                   axis=-1).astype(out_ref.dtype)


# ---------------------------------------------------------------------------
# Helpers
# ---------------------------------------------------------------------------
def _to2d(t):
    if t.ndim == 1:
        return t[None, :]
    if t.ndim > 2:
        return t.reshape(-1, t.shape[-1])
    return t


def _round8(n):
    return ((n + 7) // 8) * 8


def _choose_row_tile(n_rows8):
    # Small workloads: one step (no benefit splitting on single-TC parts,
    # negligible either way).  Large workloads: 2+ big steps, capped at 2048
    # rows, so both v7x TensorCores get work while per-step overhead stays
    # well amortized.
    if n_rows8 <= 512:
        return n_rows8
    return max(8, min(2048, _round8((n_rows8 + 1) // 2)))


def _block_diag(blocks, row_sizes, col_sizes):
    total_r, total_c = sum(row_sizes), sum(col_sizes)
    out = jnp.zeros((total_r, total_c), jnp.float32)
    r0 = c0 = 0
    for blk, r, c in zip(blocks, row_sizes, col_sizes):
        out = out.at[r0:r0 + r, c0:c0 + c].set(blk)
        r0 += r
        c0 += c
    return out


def _seg_avg_matrix(hidden, n_seg):
    # M[i, j] = 1/hidden if i, j are in the same hidden-sized segment else 0.
    size = hidden * n_seg
    seg = jnp.arange(size) // hidden
    return jnp.where(seg[:, None] == seg[None, :],
                     jnp.float32(1.0 / hidden), jnp.float32(0.0))


# ---------------------------------------------------------------------------
# Wrapper
# ---------------------------------------------------------------------------
def modality_specificity_forward(h_l, h_a, h_v, params):
    h_l, h_a, h_v = _to2d(h_l), _to2d(h_a), _to2d(h_v)
    n = h_l.shape[0]
    d_l, d_a, d_v = h_l.shape[1], h_a.shape[1], h_v.shape[1]
    dims = (d_l, d_a, d_v)
    D = d_l + d_a + d_v
    hidden = params["l"]["w1"].shape[1]
    shared_dim = params["shared"]["w2"].shape[1]
    out_w = D + shared_dim

    # ---- pack the three activations into one dense slab --------------------
    h_packed = jnp.concatenate([h_l, h_a, h_v], axis=-1).astype(jnp.float32)

    n8 = _round8(n)
    tile = _choose_row_tile(n8)
    grid_n = -(-n8 // tile)
    n_rows = grid_n * tile
    if n_rows != n:  # zero-pad rows; padded rows are sliced off afterwards
        h_packed = jnp.pad(h_packed, ((0, n_rows - n), (0, 0)))

    # ---- pack parameters into fused block-diagonal / bias slabs ------------
    P_l, P_a, P_v, P_s = params["l"], params["a"], params["v"], params["shared"]
    branches = (P_l, P_a, P_v)
    H3 = (hidden,) * 3

    w1_bd = _block_diag([p["w1"] for p in branches], dims, H3)       # (D, 3H)
    w2_bd = _block_diag([p["w2"] for p in branches], H3, dims)       # (3H, D)
    wgh_bd = _block_diag([p["wg_h"] for p in branches], dims, dims)  # (D, D)
    wgs_bd = _block_diag([p["wg_s"] for p in branches], dims, dims)  # (D, D)

    ln1_pack = jnp.concatenate(
        [jnp.concatenate([p["b1"] for p in branches], axis=-1),
         jnp.concatenate([p["ln_g"] for p in branches], axis=-1),
         jnp.concatenate([p["ln_b"] for p in branches], axis=-1)], axis=0)  # (3, 3H)
    bvec_pack = jnp.concatenate(
        [jnp.concatenate([p["b2"] for p in branches], axis=-1),
         jnp.concatenate([p["bg"] for p in branches], axis=-1)], axis=0)    # (2, D)
    mavg = _seg_avg_matrix(hidden, 3)                                       # (3H, 3H)

    ws1 = P_s["w1"]                                                         # (D, 2H)
    lns_pack = jnp.concatenate([P_s["b1"], P_s["ln_g"], P_s["ln_b"]], axis=0)  # (3, 2H)
    ws2 = P_s["w2"]                                                         # (2H, sd)
    bs2 = P_s["b2"]                                                         # (1, sd)

    operands = [h_packed, w1_bd, ln1_pack, mavg, w2_bd, wgh_bd, wgs_bd,
                bvec_pack, ws1, lns_pack, ws2, bs2]

    def row_spec(width):
        return pl.BlockSpec((tile, width), lambda i: (i, 0))

    def full_spec(a):
        return pl.BlockSpec(a.shape, lambda i: (0, 0))

    in_specs = [row_spec(D)] + [full_spec(a) for a in operands[1:]]
    out_specs = row_spec(out_w)
    out_shape = jax.ShapeDtypeStruct((n_rows, out_w), jnp.float32)

    # Advisory cost estimate so XLA can schedule around the custom call.
    flops = 2 * n_rows * (D * 3 * hidden + 2 * (3 * hidden) ** 2 + 3 * hidden * D
                          + 2 * D * D + D * 2 * hidden + 2 * hidden * shared_dim)
    transcendentals = n_rows * (2 * D + 4)
    param_bytes = 4 * sum(int(a.size) for a in operands[1:])
    bytes_accessed = 4 * n_rows * (D + out_w) + param_bytes
    cost = pl.CostEstimate(flops=int(flops),
                           transcendentals=int(transcendentals),
                           bytes_accessed=int(bytes_accessed))

    packed_out = pl.pallas_call(
        _msm_kernel,
        out_shape=out_shape,
        grid_spec=pltpu.PrefetchScalarGridSpec(
            num_scalar_prefetch=0,
            grid=(grid_n,),
            in_specs=in_specs,
            out_specs=out_specs,
        ),
        compiler_params=pltpu.CompilerParams(
            dimension_semantics=("parallel",),
            vmem_limit_bytes=32 * 1024 * 1024),
        cost_estimate=cost,
    )(*operands)

    packed_out = packed_out[:n]
    l_spec = packed_out[:, :d_l]
    a_spec = packed_out[:, d_l:d_l + d_a]
    v_spec = packed_out[:, d_l + d_a:D]
    shared = packed_out[:, D:]
    return l_spec, a_spec, v_spec, shared


# ---------------------------------------------------------------------------
# Parameter init (mirrors nn.Linear / nn.LayerNorm defaults; weights stored
# transposed, i.e. (in, out), so the kernel does row-major matmuls)
# ---------------------------------------------------------------------------
def _linear_params(key, fan_in, fan_out):
    kw, kb = jax.random.split(key)
    bound = 1.0 / (fan_in ** 0.5)
    w = jax.random.uniform(kw, (fan_in, fan_out), jnp.float32, -bound, bound)
    b = jax.random.uniform(kb, (1, fan_out), jnp.float32, -bound, bound)
    return w, b


def init_params(key, d_l, d_a, d_v, hidden_dim):
    ks = jax.random.split(key, 5)

    def branch_params(k, d):
        k1, k2, k3 = jax.random.split(k, 3)
        w1, b1 = _linear_params(k1, d, hidden_dim)
        w2, b2 = _linear_params(k2, hidden_dim, d)
        wg, bg = _linear_params(k3, 2 * d, d)
        return dict(w1=w1, b1=b1,
                    ln_g=jnp.ones((1, hidden_dim), jnp.float32),
                    ln_b=jnp.zeros((1, hidden_dim), jnp.float32),
                    w2=w2, b2=b2,
                    wg_h=wg[:d], wg_s=wg[d:], bg=bg)

    D = d_l + d_a + d_v
    shared_dim = D // 3
    ws1, bs1 = _linear_params(ks[3], D, 2 * hidden_dim)
    ws2, bs2 = _linear_params(ks[4], 2 * hidden_dim, shared_dim)
    shared = dict(w1=ws1, b1=bs1,
                  ln_g=jnp.ones((1, 2 * hidden_dim), jnp.float32),
                  ln_b=jnp.zeros((1, 2 * hidden_dim), jnp.float32),
                  w2=ws2, b2=bs2)
    return dict(l=branch_params(ks[0], d_l),
                a=branch_params(ks[1], d_a),
                v=branch_params(ks[2], d_v),
                shared=shared)


# ---------------------------------------------------------------------------
# Pure-JAX reference (explicit concatenations, matching the PyTorch code)
# ---------------------------------------------------------------------------
def _reference_forward(h_l, h_a, h_v, params):
    h_l, h_a, h_v = _to2d(h_l), _to2d(h_a), _to2d(h_v)

    def ln(z, g, b):
        mu = jnp.mean(z, axis=-1, keepdims=True)
        var = jnp.mean((z - mu) ** 2, axis=-1, keepdims=True)
        return (z - mu) * jax.lax.rsqrt(var + _LN_EPS) * g + b

    def branch(h, p):
        r = jnp.maximum(ln(h @ p["w1"] + p["b1"], p["ln_g"], p["ln_b"]), 0.0)
        s_raw = jnp.tanh(r @ p["w2"] + p["b2"])
        wg = jnp.concatenate([p["wg_h"], p["wg_s"]], axis=0)
        gate_logit = jnp.concatenate([h, s_raw], axis=-1) @ wg + p["bg"]
        gate = 1.0 / (1.0 + jnp.exp(-gate_logit))
        return s_raw * gate + h * (1.0 - gate)

    l_spec = branch(h_l, params["l"])
    a_spec = branch(h_a, params["a"])
    v_spec = branch(h_v, params["v"])

    ps = params["shared"]
    cat = jnp.concatenate([h_l, h_a, h_v], axis=-1)
    r = jnp.maximum(ln(cat @ ps["w1"] + ps["b1"], ps["ln_g"], ps["ln_b"]), 0.0)
    shared = r @ ps["w2"] + ps["b2"]
    return l_spec, a_spec, v_spec, shared


# ---------------------------------------------------------------------------
if __name__ == "__main__":
    # Small shapes consistent with the module: d_l=48, d_a=16, d_v=32, hidden=32,
    # inputs given as (batch=2, seq=8, dim) to exercise the >2D flattening path.
    # Packed output width = 48+16+32+32 = 128 lanes (one full vreg lane width).
    d_l, d_a, d_v, hidden_dim = 48, 16, 32, 32
    batch, seq = 2, 8

    key = jax.random.PRNGKey(0)
    k_l, k_a, k_v, k_p = jax.random.split(key, 4)
    h_l = jax.random.normal(k_l, (batch, seq, d_l), dtype=jnp.float32)
    h_a = jax.random.normal(k_a, (batch, seq, d_a), dtype=jnp.float32)
    h_v = jax.random.normal(k_v, (batch, seq, d_v), dtype=jnp.float32)

    params = init_params(k_p, d_l, d_a, d_v, hidden_dim)

    outs = modality_specificity_forward(h_l, h_a, h_v, params)
    outs = jax.block_until_ready(outs)

    refs = _reference_forward(h_l, h_a, h_v, params)

    n_rows = batch * seq
    shared_dim = (d_l + d_a + d_v) // 3
    expected = [(n_rows, d_l), (n_rows, d_a), (n_rows, d_v), (n_rows, shared_dim)]
    for o, r, shp in zip(outs, refs, expected):
        assert o.shape == shp, (o.shape, shp)
        err = float(jnp.max(jnp.abs(o - r)))
        assert jnp.allclose(o, r, atol=1e-4, rtol=1e-4), err

    print("KERNEL_OK")
</pallas_src>

<mosaic_0001>
module attributes {stable_mosaic.version = 11 : i64} {
  func.func @_msm_kernel(%arg0: i32, %arg1: memref<16x96xf32, #tpu.memory_space<vmem>>, %arg2: memref<96x96xf32, #tpu.memory_space<vmem>>, %arg3: memref<3x96xf32, #tpu.memory_space<vmem>>, %arg4: memref<96x96xf32, #tpu.memory_space<vmem>>, %arg5: memref<96x96xf32, #tpu.memory_space<vmem>>, %arg6: memref<96x96xf32, #tpu.memory_space<vmem>>, %arg7: memref<96x96xf32, #tpu.memory_space<vmem>>, %arg8: memref<2x96xf32, #tpu.memory_space<vmem>>, %arg9: memref<96x64xf32, #tpu.memory_space<vmem>>, %arg10: memref<3x64xf32, #tpu.memory_space<vmem>>, %arg11: memref<64x32xf32, #tpu.memory_space<vmem>>, %arg12: memref<1x32xf32, #tpu.memory_space<vmem>>, %arg13: memref<16x128xf32, #tpu.memory_space<vmem>>) attributes {dimension_semantics = [#tpu.dimension_semantics<parallel>], iteration_bounds = array<i64: 1>, scalar_prefetch = 0 : i64, scratch_operands = 0 : i64, tpu.core_type = #tpu.core_type<tc>, window_params = [{transform_indices = @transform_0, window_bounds = array<i64: 16, 96>}, {pipeline_mode = #tpu.pipeline_mode<synchronous>, transform_indices = @transform_1, window_bounds = array<i64: 96, 96>}, {pipeline_mode = #tpu.pipeline_mode<synchronous>, transform_indices = @transform_2, window_bounds = array<i64: 3, 96>}, {pipeline_mode = #tpu.pipeline_mode<synchronous>, transform_indices = @transform_3, window_bounds = array<i64: 96, 96>}, {pipeline_mode = #tpu.pipeline_mode<synchronous>, transform_indices = @transform_4, window_bounds = array<i64: 96, 96>}, {pipeline_mode = #tpu.pipeline_mode<synchronous>, transform_indices = @transform_5, window_bounds = array<i64: 96, 96>}, {pipeline_mode = #tpu.pipeline_mode<synchronous>, transform_indices = @transform_6, window_bounds = array<i64: 96, 96>}, {pipeline_mode = #tpu.pipeline_mode<synchronous>, transform_indices = @transform_7, window_bounds = array<i64: 2, 96>}, {pipeline_mode = #tpu.pipeline_mode<synchronous>, transform_indices = @transform_8, window_bounds = array<i64: 96, 64>}, {pipeline_mode = #tpu.pipeline_mode<synchronous>, transform_indices = @transform_9, window_bounds = array<i64: 3, 64>}, {pipeline_mode = #tpu.pipeline_mode<synchronous>, transform_indices = @transform_10, window_bounds = array<i64: 64, 32>}, {pipeline_mode = #tpu.pipeline_mode<synchronous>, transform_indices = @transform_11, window_bounds = array<i64: 1, 32>}, {transform_indices = @transform_12, window_bounds = array<i64: 16, 128>}]} {
    %c0 = arith.constant 0 : index
    %c0_0 = arith.constant 0 : index
    %0 = vector.load %arg1[%c0, %c0_0] : memref<16x96xf32, #tpu.memory_space<vmem>>, vector<16x96xf32>
    %c0_1 = arith.constant 0 : index
    %c0_2 = arith.constant 0 : index
    %1 = vector.load %arg2[%c0_1, %c0_2] : memref<96x96xf32, #tpu.memory_space<vmem>>, vector<96x96xf32>
    %cst = arith.constant dense<0.000000e+00> : vector<16x96xf32>
    %2 = tpu.matmul %0, %1, %cst {dimension_numbers = #tpu.dot_dimension_numbers<[1], [0], [0], [1], [0, 0, 1, 1], [], []>} : vector<16x96xf32>, vector<96x96xf32>, vector<16x96xf32> -> vector<16x96xf32>
    %c0_3 = arith.constant 0 : index
    %c0_4 = arith.constant 0 : index
    %3 = vector.load %arg3[%c0_3, %c0_4] : memref<3x96xf32, #tpu.memory_space<vmem>>, vector<1x96xf32>
    %4 = vector.broadcast %3 : vector<1x96xf32> to vector<16x96xf32>
    %5 = arith.addf %2, %4 : vector<16x96xf32>
    %c0_5 = arith.constant 0 : index
    %c0_6 = arith.constant 0 : index
    %6 = vector.load %arg4[%c0_5, %c0_6] : memref<96x96xf32, #tpu.memory_space<vmem>>, vector<96x96xf32>
    %cst_7 = arith.constant dense<0.000000e+00> : vector<16x96xf32>
    %7 = tpu.matmul %5, %6, %cst_7 {dimension_numbers = #tpu.dot_dimension_numbers<[1], [0], [0], [1], [0, 0, 1, 1], [], []>} : vector<16x96xf32>, vector<96x96xf32>, vector<16x96xf32> -> vector<16x96xf32>
    %8 = arith.subf %5, %7 : vector<16x96xf32>
    %9 = arith.mulf %8, %8 : vector<16x96xf32>
    %c0_8 = arith.constant 0 : index
    %c0_9 = arith.constant 0 : index
    %10 = vector.load %arg4[%c0_8, %c0_9] : memref<96x96xf32, #tpu.memory_space<vmem>>, vector<96x96xf32>
    %cst_10 = arith.constant dense<0.000000e+00> : vector<16x96xf32>
    %11 = tpu.matmul %9, %10, %cst_10 {dimension_numbers = #tpu.dot_dimension_numbers<[1], [0], [0], [1], [0, 0, 1, 1], [], []>} : vector<16x96xf32>, vector<96x96xf32>, vector<16x96xf32> -> vector<16x96xf32>
    %cst_11 = arith.constant 9.99999974E-6 : f32
    %12 = vector.broadcast %cst_11 : f32 to vector<16x96xf32>
    %13 = arith.addf %11, %12 : vector<16x96xf32>
    %14 = math.rsqrt %13 : vector<16x96xf32>
    %15 = arith.mulf %8, %14 : vector<16x96xf32>
    %c1 = arith.constant 1 : index
    %c0_12 = arith.constant 0 : index
    %16 = vector.load %arg3[%c1, %c0_12] : memref<3x96xf32, #tpu.memory_space<vmem>>, vector<1x96xf32>
    %17 = vector.broadcast %16 : vector<1x96xf32> to vector<16x96xf32>
    %18 = arith.mulf %15, %17 : vector<16x96xf32>
    %c2 = arith.constant 2 : index
    %c0_13 = arith.constant 0 : index
    %19 = vector.load %arg3[%c2, %c0_13] : memref<3x96xf32, #tpu.memory_space<vmem>>, vector<1x96xf32>
    %20 = vector.broadcast %19 : vector<1x96xf32> to vector<16x96xf32>
    %21 = arith.addf %18, %20 : vector<16x96xf32>
    %cst_14 = arith.constant 0.000000e+00 : f32
    %22 = vector.broadcast %cst_14 : f32 to vector<16x96xf32>
    %23 = arith.maximumf %21, %22 : vector<16x96xf32>
    %c0_15 = arith.constant 0 : index
    %c0_16 = arith.constant 0 : index
    %24 = vector.load %arg5[%c0_15, %c0_16] : memref<96x96xf32, #tpu.memory_space<vmem>>, vector<96x96xf32>
    %cst_17 = arith.constant dense<0.000000e+00> : vector<16x96xf32>
    %25 = tpu.matmul %23, %24, %cst_17 {dimension_numbers = #tpu.dot_dimension_numbers<[1], [0], [0], [1], [0, 0, 1, 1], [], []>} : vector<16x96xf32>, vector<96x96xf32>, vector<16x96xf32> -> vector<16x96xf32>
    %c0_18 = arith.constant 0 : index
    %c0_19 = arith.constant 0 : index
    %26 = vector.load %arg8[%c0_18, %c0_19] : memref<2x96xf32, #tpu.memory_space<vmem>>, vector<1x96xf32>
    %27 = vector.broadcast %26 : vector<1x96xf32> to vector<16x96xf32>
    %28 = arith.addf %25, %27 : vector<16x96xf32>
    %29 = math.tanh %28 : vector<16x96xf32>
    %c0_20 = arith.constant 0 : index
    %c0_21 = arith.constant 0 : index
    %30 = vector.load %arg6[%c0_20, %c0_21] : memref<96x96xf32, #tpu.memory_space<vmem>>, vector<96x96xf32>
    %cst_22 = arith.constant dense<0.000000e+00> : vector<16x96xf32>
    %31 = tpu.matmul %0, %30, %cst_22 {dimension_numbers = #tpu.dot_dimension_numbers<[1], [0], [0], [1], [0, 0, 1, 1], [], []>} : vector<16x96xf32>, vector<96x96xf32>, vector<16x96xf32> -> vector<16x96xf32>
    %c0_23 = arith.constant 0 : index
    %c0_24 = arith.constant 0 : index
    %32 = vector.load %arg7[%c0_23, %c0_24] : memref<96x96xf32, #tpu.memory_space<vmem>>, vector<96x96xf32>
    %cst_25 = arith.constant dense<0.000000e+00> : vector<16x96xf32>
    %33 = tpu.matmul %29, %32, %cst_25 {dimension_numbers = #tpu.dot_dimension_numbers<[1], [0], [0], [1], [0, 0, 1, 1], [], []>} : vector<16x96xf32>, vector<96x96xf32>, vector<16x96xf32> -> vector<16x96xf32>
    %34 = arith.addf %31, %33 : vector<16x96xf32>
    %c1_26 = arith.constant 1 : index
    %c0_27 = arith.constant 0 : index
    %35 = vector.load %arg8[%c1_26, %c0_27] : memref<2x96xf32, #tpu.memory_space<vmem>>, vector<1x96xf32>
    %36 = vector.broadcast %35 : vector<1x96xf32> to vector<16x96xf32>
    %37 = arith.addf %34, %36 : vector<16x96xf32>
    %cst_28 = arith.constant 0.000000e+00 : f32
    %38 = vector.broadcast %cst_28 : f32 to vector<16x96xf32>
    %39 = arith.subf %38, %37 : vector<16x96xf32>
    %40 = math.exp %39 : vector<16x96xf32>
    %cst_29 = arith.constant 1.000000e+00 : f32
    %41 = vector.broadcast %cst_29 : f32 to vector<16x96xf32>
    %42 = arith.addf %41, %40 : vector<16x96xf32>
    %cst_30 = arith.constant 1.000000e+00 : f32
    %43 = vector.broadcast %cst_30 : f32 to vector<16x96xf32>
    %44 = arith.divf %43, %42 : vector<16x96xf32>
    %45 = arith.subf %29, %0 : vector<16x96xf32>
    %46 = arith.mulf %44, %45 : vector<16x96xf32>
    %47 = arith.addf %0, %46 : vector<16x96xf32>
    %c0_31 = arith.constant 0 : index
    %c0_32 = arith.constant 0 : index
    %48 = vector.load %arg9[%c0_31, %c0_32] : memref<96x64xf32, #tpu.memory_space<vmem>>, vector<96x64xf32>
    %cst_33 = arith.constant dense<0.000000e+00> : vector<16x64xf32>
    %49 = tpu.matmul %0, %48, %cst_33 {dimension_numbers = #tpu.dot_dimension_numbers<[1], [0], [0], [1], [0, 0, 1, 1], [], []>} : vector<16x96xf32>, vector<96x64xf32>, vector<16x64xf32> -> vector<16x64xf32>
    %c0_34 = arith.constant 0 : index
    %c0_35 = arith.constant 0 : index
    %50 = vector.load %arg10[%c0_34, %c0_35] : memref<3x64xf32, #tpu.memory_space<vmem>>, vector<1x64xf32>
    %51 = vector.broadcast %50 : vector<1x64xf32> to vector<16x64xf32>
    %52 = arith.addf %49, %51 : vector<16x64xf32>
    %cst_36 = arith.constant dense<0.000000e+00> : vector<16xf32>
    %53 = vector.multi_reduction <add>, %52, %cst_36 [1] : vector<16x64xf32> to vector<16xf32>
    %54 = vector.shape_cast %53 : vector<16xf32> to vector<16x1xf32>
    %cst_37 = arith.constant 6.400000e+01 : f32
    %55 = vector.broadcast %cst_37 : f32 to vector<16x1xf32>
    %56 = arith.divf %54, %55 : vector<16x1xf32>
    %57 = vector.broadcast %56 : vector<16x1xf32> to vector<16x64xf32>
    %58 = arith.subf %52, %57 : vector<16x64xf32>
    %59 = arith.mulf %58, %58 : vector<16x64xf32>
    %cst_38 = arith.constant dense<0.000000e+00> : vector<16xf32>
    %60 = vector.multi_reduction <add>, %59, %cst_38 [1] : vector<16x64xf32> to vector<16xf32>
    %61 = vector.shape_cast %60 : vector<16xf32> to vector<16x1xf32>
    %cst_39 = arith.constant 6.400000e+01 : f32
    %62 = vector.broadcast %cst_39 : f32 to vector<16x1xf32>
    %63 = arith.divf %61, %62 : vector<16x1xf32>
    %cst_40 = arith.constant 9.99999974E-6 : f32
    %64 = vector.broadcast %cst_40 : f32 to vector<16x1xf32>
    %65 = arith.addf %63, %64 : vector<16x1xf32>
    %66 = math.rsqrt %65 : vector<16x1xf32>
    %67 = vector.broadcast %66 : vector<16x1xf32> to vector<16x64xf32>
    %68 = arith.mulf %58, %67 : vector<16x64xf32>
    %c1_41 = arith.constant 1 : index
    %c0_42 = arith.constant 0 : index
    %69 = vector.load %arg10[%c1_41, %c0_42] : memref<3x64xf32, #tpu.memory_space<vmem>>, vector<1x64xf32>
    %70 = vector.broadcast %69 : vector<1x64xf32> to vector<16x64xf32>
    %71 = arith.mulf %68, %70 : vector<16x64xf32>
    %c2_43 = arith.constant 2 : index
    %c0_44 = arith.constant 0 : index
    %72 = vector.load %arg10[%c2_43, %c0_44] : memref<3x64xf32, #tpu.memory_space<vmem>>, vector<1x64xf32>
    %73 = vector.broadcast %72 : vector<1x64xf32> to vector<16x64xf32>
    %74 = arith.addf %71, %73 : vector<16x64xf32>
    %cst_45 = arith.constant 0.000000e+00 : f32
    %75 = vector.broadcast %cst_45 : f32 to vector<16x64xf32>
    %76 = arith.maximumf %74, %75 : vector<16x64xf32>
    %c0_46 = arith.constant 0 : index
    %c0_47 = arith.constant 0 : index
    %77 = vector.load %arg11[%c0_46, %c0_47] : memref<64x32xf32, #tpu.memory_space<vmem>>, vector<64x32xf32>
    %cst_48 = arith.constant dense<0.000000e+00> : vector<16x32xf32>
    %78 = tpu.matmul %76, %77, %cst_48 {dimension_numbers = #tpu.dot_dimension_numbers<[1], [0], [0], [1], [0, 0, 1, 1], [], []>} : vector<16x64xf32>, vector<64x32xf32>, vector<16x32xf32> -> vector<16x32xf32>
    %c0_49 = arith.constant 0 : index
    %c0_50 = arith.constant 0 : index
    %79 = vector.load %arg12[%c0_49, %c0_50] : memref<1x32xf32, #tpu.memory_space<vmem>>, vector<1x32xf32>
    %80 = vector.broadcast %79 : vector<1x32xf32> to vector<16x32xf32>
    %81 = arith.addf %78, %80 : vector<16x32xf32>
    %82 = tpu.concatenate %47, %81 in 1 : vector<16x96xf32>, vector<16x32xf32> -> vector<16x128xf32>
    %c0_51 = arith.constant 0 : index
    %c0_52 = arith.constant 0 : index
    %83 = vector.load %arg13[%c0_51, %c0_52] : memref<16x128xf32, #tpu.memory_space<vmem>>, vector<16x128xf32>
    tpu.vector_store %arg13[%c0_51, %c0_52], %82 {strides = array<i32>} : memref<16x128xf32, #tpu.memory_space<vmem>>, vector<16x128xf32>,
    return
  }
  func.func @transform_0(%arg0: i32) -> (i32, i32) {
    %c0_i32 = arith.constant 0 : i32
    %c0_i32_0 = arith.constant 0 : i32
    return %arg0, %c0_i32 : i32, i32
  }
  func.func @transform_1(%arg0: i32) -> (i32, i32) {
    %c0_i32 = arith.constant 0 : i32
    %c0_i32_0 = arith.constant 0 : i32
    %c0_i32_1 = arith.constant 0 : i32
    return %c0_i32, %c0_i32_0 : i32, i32
  }
  func.func @transform_2(%arg0: i32) -> (i32, i32) {
    %c0_i32 = arith.constant 0 : i32
    %c0_i32_0 = arith.constant 0 : i32
    %c0_i32_1 = arith.constant 0 : i32
    return %c0_i32, %c0_i32_0 : i32, i32
  }
  func.func @transform_3(%arg0: i32) -> (i32, i32) {
    %c0_i32 = arith.constant 0 : i32
    %c0_i32_0 = arith.constant 0 : i32
    %c0_i32_1 = arith.constant 0 : i32
    return %c0_i32, %c0_i32_0 : i32, i32
  }
  func.func @transform_4(%arg0: i32) -> (i32, i32) {
    %c0_i32 = arith.constant 0 : i32
    %c0_i32_0 = arith.constant 0 : i32
    %c0_i32_1 = arith.constant 0 : i32
    return %c0_i32, %c0_i32_0 : i32, i32
  }
  func.func @transform_5(%arg0: i32) -> (i32, i32) {
    %c0_i32 = arith.constant 0 : i32
    %c0_i32_0 = arith.constant 0 : i32
    %c0_i32_1 = arith.constant 0 : i32
    return %c0_i32, %c0_i32_0 : i32, i32
  }
  func.func @transform_6(%arg0: i32) -> (i32, i32) {
    %c0_i32 = arith.constant 0 : i32
    %c0_i32_0 = arith.constant 0 : i32
    %c0_i32_1 = arith.constant 0 : i32
    return %c0_i32, %c0_i32_0 : i32, i32
  }
  func.func @transform_7(%arg0: i32) -> (i32, i32) {
    %c0_i32 = arith.constant 0 : i32
    %c0_i32_0 = arith.constant 0 : i32
    %c0_i32_1 = arith.constant 0 : i32
    return %c0_i32, %c0_i32_0 : i32, i32
  }
  func.func @transform_8(%arg0: i32) -> (i32, i32) {
    %c0_i32 = arith.constant 0 : i32
    %c0_i32_0 = arith.constant 0 : i32
    %c0_i32_1 = arith.constant 0 : i32
    return %c0_i32, %c0_i32_0 : i32, i32
  }
  func.func @transform_9(%arg0: i32) -> (i32, i32) {
    %c0_i32 = arith.constant 0 : i32
    %c0_i32_0 = arith.constant 0 : i32
    %c0_i32_1 = arith.constant 0 : i32
    return %c0_i32, %c0_i32_0 : i32, i32
  }
  func.func @transform_10(%arg0: i32) -> (i32, i32) {
    %c0_i32 = arith.constant 0 : i32
    %c0_i32_0 = arith.constant 0 : i32
    %c0_i32_1 = arith.constant 0 : i32
    return %c0_i32, %c0_i32_0 : i32, i32
  }
  func.func @transform_11(%arg0: i32) -> (i32, i32) {
    %c0_i32 = arith.constant 0 : i32
    %c0_i32_0 = arith.constant 0 : i32
    %c0_i32_1 = arith.constant 0 : i32
    return %c0_i32, %c0_i32_0 : i32, i32
  }
  func.func @transform_12(%arg0: i32) -> (i32, i32) {
    %c0_i32 = arith.constant 0 : i32
    %c0_i32_0 = arith.constant 0 : i32
    return %arg0, %c0_i32 : i32, i32
  }
}

</mosaic_0001>

<bundles_post_ra>
// kernel: tpu_custom_call.1
= control target key start
LH: loop header
LB: loop body
LE: loop exit
PB: predicated region body
PF: predicated region fallthrough
CT: control target
= control target key end

     0   :  { %17 = vsyncpa [#allocation3], 0  ;;  %s1753_s0 = inlined_call_operand.hbm [shape: f32[16,96], index: 0, kind: input, shape index: {}]   ;;  %s1754_s1 = inlined_call_operand.vmem [shape: f32[96,96], index: 1, kind: input, shape index: {}]   ;;  %s1755_s2 = inlined_call_operand.vmem [shape: f32[3,96], index: 2, kind: input, shape index: {}]   ;;  %s1756_s3 = inlined_call_operand.vmem [shape: f32[96,96], index: 3, kind: input, shape index: {}]   ;;  %s1757_s4 = inlined_call_operand.hbm [shape: f32[96,96], index: 4, kind: input, shape index: {}]   ;;  %s1758_s5 = inlined_call_operand.hbm [shape: f32[96,96], index: 5, kind: input, shape index: {}]   ;;  %s1759_s6 = inlined_call_operand.hbm [shape: f32[96,96], index: 6, kind: input, shape index: {}]   ;;  %s1760_s7 = inlined_call_operand.vmem [shape: f32[2,96], index: 7, kind: input, shape index: {}]   ;;  %s1761_s8 = inlined_call_operand.vmem [shape: f32[96,64], index: 8, kind: input, shape index: {}]   ;;  %s1762_s9 = inlined_call_operand.vmem [shape: f32[3,64], index: 9, kind: input, shape index: {}]   ;;  %s1763_s10 = inlined_call_operand.vmem [shape: f32[64,32], index: 10, kind: input, shape index: {}]   ;;  %s1764_s11 = inlined_call_operand.vmem [shape: f32[1,32], index: 11, kind: input, shape index: {}]   ;;  %s1765_s12 = inlined_call_operand.hbm [shape: f32[16,128], index: 12, kind: output, shape index: {}]  }
   0x1   :  { %18 = vsyncpa [#allocation6], 0 }
   0x2   :  { %19 = vsyncpa [#allocation9], 0 }
   0x3   :  { %20 = vsyncpa [#allocation4], 0  ;;  %s1441_s21 = smov [#allocation5]   ;;  %s1442_s23 = smov [#allocation2]  }
   0x4   :  { %s44_s22 = sshll.u32 %s1441_s21, 4  ;;  %s26_s24 = sshll.u32 %s1442_s23, 4  ;;  %s45_s22 = int_to_ptr.vmem [resolvable:$true] %s44_s22  ;;  %s27_s24 = int_to_ptr.vmem [resolvable:$true] %s26_s24 }
   0x5   :  { %s1341_s25 = scalar_lea.vmem %s45_s22, 1536  ;;  %p1346_p1 = scmp.lt.s32.totalorder %s45_s22, %s45_s22 }
   0x6   :  { %p1342_p0 = scmp.ne.s32.totalorder %s45_s22, %s1341_s25  ;;  %p1347_p2 = scmp.lt.s32.totalorder %s1341_s25, %s1341_s25 }
   0x8   :  { %p1348_p3 = por %p1347_p2, %p1346_p1 }
   0xa   :  { %p1349_p4 = pnand %p1348_p3, %p1342_p0 }
   0xc   :  { %1352 = shalt.err (!%p1349_p4)
}
   0xd   :  { %s1443_s26 = smov 128   ;;  %s1444_s27 = smov 8  }
   0xe   :  { %50 = dma.hbm_to_vmem [thread:$0]  %s1757_s4, 1536, %s45_s22, [#allocation6], %s1443_s26, %s1443_s26, %s1444_s27  }
   0xf   :  { %s1361_s30 = scalar_lea.vmem %s27_s24, 256  ;;  %p1366_p6 = scmp.lt.s32.totalorder %s27_s24, %s27_s24 }
  0x10   :  { %p1362_p5 = scmp.ne.s32.totalorder %s27_s24, %s1361_s30  ;;  %p1367_p7 = scmp.lt.s32.totalorder %s1361_s30, %s1361_s30 }
  0x12   :  { %p1368_p8 = por %p1367_p7, %p1366_p6 }
  0x14   :  { %p1369_p9 = pnand %p1368_p8, %p1362_p5 }
  0x16   :  { %1372 = shalt.err (!%p1369_p9)
}
  0x17   :  { %32 = dma.hbm_to_vmem [thread:$0]  %s1753_s0, 256, %s27_s24, [#allocation3], %s1443_s26, %s1443_s26, %s1444_s27  }
  0x18   :  { %s1445_s15 = smov [#allocation7]   ;;  %s1446_s17 = smov [#allocation8]  }
  0x19   :  { %s56_s16 = sshll.u32 %s1445_s15, 4  ;;  %s68_s18 = sshll.u32 %s1446_s17, 4  ;;  %s57_s16 = int_to_ptr.vmem [resolvable:$true] %s56_s16  ;;  %s69_s18 = int_to_ptr.vmem [resolvable:$true] %s68_s18 }
  0x1a   :  { %s1381_s4 = scalar_lea.vmem %s57_s16, 1536  ;;  %p1386_p11 = scmp.lt.s32.totalorder %s57_s16, %s57_s16 }
  0x1b   :  { %p1382_p10 = scmp.ne.s32.totalorder %s57_s16, %s1381_s4  ;;  %p1387_p12 = scmp.lt.s32.totalorder %s1381_s4, %s1381_s4 }
  0x1d   :  { %p1388_p13 = por %p1387_p12, %p1386_p11 }
  0x1f   :  { %p1389_p0 = pnand %p1388_p13, %p1382_p10 }
  0x21   :  { %1392 = shalt.err (!%p1389_p0)
}
  0x22   :  { %62 = dma.hbm_to_vmem [thread:$0]  %s1758_s5, 1536, %s57_s16, [#allocation6], %s1443_s26, %s1443_s26, %s1444_s27  }
  0x23   :  { %s1401_s0 = scalar_lea.vmem %s69_s18, 1536  ;;  %p1406_p2 = scmp.lt.s32.totalorder %s69_s18, %s69_s18 }
  0x24   :  { %p1402_p1 = scmp.ne.s32.totalorder %s69_s18, %s1401_s0  ;;  %p1407_p3 = scmp.lt.s32.totalorder %s1401_s0, %s1401_s0 }
  0x26   :  { %p1408_p4 = por %p1407_p3, %p1406_p2 }
  0x28   :  { %p1409_p5 = pnand %p1408_p4, %p1402_p1 }
  0x2a   :  { %1412 = shalt.err (!%p1409_p5)
}
  0x2b   :  { %74 = dma.hbm_to_vmem [thread:$0]  %s1759_s6, 1536, %s69_s18, [#allocation9], %s1443_s26, %s1443_s26, %s1444_s27  }
  0x2c   :  { %1433 = dma.done.wait [#allocation3], 256  }
  0x2d   :  { %1434 = vsyncadd [#allocation3], 4294967040 }
  0x2e   :  { %1435 = dma.done.wait [#allocation6], 3072  }
  0x2f   :  { %1436 = vsyncadd [#allocation6], 4294964224 }
  0x30   :  { %1437 = dma.done.wait [#allocation9], 1536  }
  0x31   :  { %1438 = vsyncadd [#allocation9], 4294965760  ;;  %v110_v0 = vld [vmem:[%s1754_s1 + $0x58] sm:$0xff]  ;;  %v109_v1 = vld [vmem:[%s1754_s1 + $0x50] sm:$0xff]  ;;  %vm116_vm0 = vcmask 785408   ;;  %vm793_vm1 = vcmask 523264  }
  0x32   :  { %1097 = vmatprep.subr.mxu0 %v110_v0  ;;  %v108_v2 = vld [vmem:[%s1754_s1 + $0x48] sm:$0xff]  ;;  %v107_v3 = vld [vmem:[%s1754_s1 + $0x40] sm:$0xff]  ;;  %v209_v5 = vld [vmem:[%s1756_s3 + $0x58] sm:$0xff]  ;;  %s1448_s4 = smov [#allocation10]  }
  0x33   :  { %1098 = vmatpush3.msra.mxu0 %v110_v0  ;;  %v1550_v4 = vld [vmem:[#allocation2] sm:$0xff]  ;;  %v208_v6 = vld [vmem:[%s1756_s3 + $0x50] sm:$0xff]  ;;  %v106_v7 = vld [vmem:[%s1754_s1 + $0x38] sm:$0xff]  ;;  %1124 = vmatprep.subr.mxu1 %v209_v5  ;;  %s950_s19 = sshll.u32 %s1448_s4, 4  ;;  %s951_s19 = int_to_ptr.vmem [resolvable:$true] %s950_s19 }
  0x34   :  { %1099 = vmatprep.subr.mxu0 %v109_v1  ;;  %1121 = vmatprep.mubr.msk.f32.mxu0 %vm116_vm0, %v1550_v4  ;;  %v207_v8 = vld [vmem:[%s1756_s3 + $0x48] sm:$0xff]  ;;  %v105_v9 = vld [vmem:[%s1754_s1 + $0x30] sm:$0xff]  ;;  %v206_v10 = vld [vmem:[%s1756_s3 + $0x40] sm:$0xff]  ;;  %p1418_p7 = scmp.lt.s32.totalorder %s951_s19, %s951_s19 }
  0x35   :  { %1100 = vmatpush3.msra.mxu0 %v109_v1  ;;  %1125 = vmatpush3.msra.mxu1 %v209_v5  ;;  %v104_v11 = vld [vmem:[%s1754_s1 + $0x28] sm:$0xff]  ;;  %v205_v12 = vld [vmem:[%s1756_s3 + $0x38] sm:$0xff]  ;;  %v103_v13 = vld [vmem:[%s1754_s1 + $0x20] sm:$0xff] }
  0x36   :  { %1101 = vmatprep.subr.mxu0 %v108_v2  ;;  %1126 = vmatprep.subr.mxu1 %v208_v6  ;;  %v204_v14 = vld [vmem:[%s1756_s3 + $0x30] sm:$0xff]  ;;  %v102_v15 = vld [vmem:[%s1754_s1 + $0x18] sm:$0xff]  ;;  %v203_v16 = vld [vmem:[%s1756_s3 + $0x28] sm:$0xff] }
  0x37   :  { %1102 = vmatpush3.msra.mxu0 %v108_v2  ;;  %1127 = vmatpush3.msra.mxu1 %v208_v6  ;;  %v101_v17 = vld [vmem:[%s1754_s1 + $0x10] sm:$0xff]  ;;  %v202_v18 = vld [vmem:[%s1756_s3 + $0x20] sm:$0xff]  ;;  %v100_v19 = vld [vmem:[%s1754_s1 + $0x8] sm:$0xff] }
  0x38   :  { %1103 = vmatprep.subr.mxu0 %v107_v3  ;;  %1128 = vmatprep.subr.mxu1 %v207_v8  ;;  %v201_v20 = vld [vmem:[%s1756_s3 + $0x18] sm:$0xff]  ;;  %v99_v21 = vld [vmem:[%s1754_s1] sm:$0xff]  ;;  %v1605_v22 = vld [vmem:[#allocation2 + $0x8] sm:$0xff] }
  0x39   :  { %1104 = vmatpush3.msra.mxu0 %v107_v3  ;;  %1129 = vmatpush3.msra.mxu1 %v207_v8  ;;  %v200_v23 = vld [vmem:[%s1756_s3 + $0x10] sm:$0xff]  ;;  %v199_v24 = vld [vmem:[%s1756_s3 + $0x8] sm:$0xff]  ;;  %v198_v25 = vld [vmem:[%s1756_s3] sm:$0xff] }
  0x3a   :  { %1105 = vmatprep.subr.mxu0 %v106_v7  ;;  %1130 = vmatprep.subr.mxu1 %v206_v10  ;;  %v964_v27 = vld [vmem:[%s1755_s2] ss:$0 sm:$0xff]  ;;  %v407_v37 = vld [vmem:[#allocation5 + $0x58] sm:$0xff]  ;;  %v405_v39 = vld [vmem:[#allocation5 + $0x48] sm:$0xff] }
  0x3b   :  { %1106 = vmatpush3.msra.mxu0 %v106_v7  ;;  %1131 = vmatpush3.msra.mxu1 %v206_v10  ;;  %v406_v38 = vld [vmem:[#allocation5 + $0x50] sm:$0xff]  ;;  %v404_v40 = vld [vmem:[#allocation5 + $0x40] sm:$0xff]  ;;  %v403_v41 = vld [vmem:[#allocation5 + $0x38] sm:$0xff] }
  0x3c   :  { %1107 = vmatprep.subr.mxu0 %v105_v9  ;;  %1132 = vmatprep.subr.mxu1 %v205_v12  ;;  %v402_v42 = vld [vmem:[#allocation5 + $0x30] sm:$0xff]  ;;  %v401_v43 = vld [vmem:[#allocation5 + $0x28] sm:$0xff]  ;;  %v400_v44 = vld [vmem:[#allocation5 + $0x20] sm:$0xff] }
  0x3d   :  { %1108 = vmatpush3.msra.mxu0 %v105_v9  ;;  %1133 = vmatpush3.msra.mxu1 %v205_v12  ;;  %v399_v45 = vld [vmem:[#allocation5 + $0x18] sm:$0xff]  ;;  %v398_v46 = vld [vmem:[#allocation5 + $0x10] sm:$0xff]  ;;  %v397_v47 = vld [vmem:[#allocation5 + $0x8] sm:$0xff] }
  0x3e   :  { %1109 = vmatprep.subr.mxu0 %v104_v11  ;;  %1134 = vmatprep.subr.mxu1 %v204_v14  ;;  %v396_v48 = vld [vmem:[#allocation5] sm:$0xff]  ;;  %v519_v49 = vld [vmem:[#allocation8 + $0x58] sm:$0xff]  ;;  %v518_v51 = vld [vmem:[#allocation8 + $0x50] sm:$0xff] }
  0x3f   :  { %1110 = vmatpush3.msra.mxu0 %v104_v11  ;;  %1135 = vmatpush3.msra.mxu1 %v204_v14  ;;  %v507_v50 = vld [vmem:[#allocation7 + $0x58] sm:$0xff]  ;;  %v517_v52 = vld [vmem:[#allocation8 + $0x48] sm:$0xff]  ;;  %v971_v58 = vld [vmem:[%s1755_s2 + $0x1] ss:$0 sm:$0xff] }
  0x40   :  { %1111 = vmatprep.subr.mxu0 %v103_v13  ;;  %1136 = vmatprep.subr.mxu1 %v203_v16  ;;  %v972_v63 = vld [vmem:[%s1755_s2 + $0x2] ss:$0 sm:$0xff]  ;;  %v505_v7 = vld [vmem:[#allocation7 + $0x48] sm:$0xff]  ;;  %v504_v9 = vld [vmem:[#allocation7 + $0x40] sm:$0xff] }
  0x41   :  { %1112 = vmatpush3.msra.mxu0 %v103_v13  ;;  %1137 = vmatpush3.msra.mxu1 %v203_v16  ;;  %v503_v11 = vld [vmem:[#allocation7 + $0x38] sm:$0xff]  ;;  %v502_v13 = vld [vmem:[#allocation7 + $0x30] sm:$0xff] }
  0x42   :  { %1113 = vmatprep.subr.mxu0 %v102_v15  ;;  %1138 = vmatprep.subr.mxu1 %v202_v18 }
  0x43   :  { %1114 = vmatpush3.msra.mxu0 %v102_v15  ;;  %1139 = vmatpush3.msra.mxu1 %v202_v18  ;;  %v501_v15 = vld [vmem:[#allocation7 + $0x28] sm:$0xff] }
  0x44   :  { %1115 = vmatprep.subr.mxu0 %v101_v17  ;;  %1140 = vmatprep.subr.mxu1 %v201_v20 }
  0x45   :  { %1116 = vmatpush3.msra.mxu0 %v101_v17  ;;  %1141 = vmatpush3.msra.mxu1 %v201_v20  ;;  %v500_v17 = vld [vmem:[#allocation7 + $0x20] sm:$0xff] }
  0x46   :  { %1117 = vmatprep.subr.mxu0 %v100_v19  ;;  %1142 = vmatprep.subr.mxu1 %v200_v23 }
  0x47   :  { %1118 = vmatpush3.msra.mxu0 %v100_v19  ;;  %1143 = vmatpush3.msra.mxu1 %v200_v23  ;;  %v499_v19 = vld [vmem:[#allocation7 + $0x18] sm:$0xff] }
  0x48   :  { %1119 = vmatprep.subr.mxu0 %v99_v21  ;;  %1144 = vmatprep.subr.mxu1 %v199_v24 }
  0x49   :  { %1120 = vmatpush3.msra.mxu0 %v99_v21  ;;  %1145 = vmatpush3.msra.mxu1 %v199_v24  ;;  %v498_v21 = vld [vmem:[#allocation7 + $0x10] sm:$0xff] }
  0x4a   :  { %1122 = vmatmul.mubr.msk.f32.vlgmr.msra.gmra.mxu0 %vm116_vm0, %v1605_v22  ;;  %1151 = vmatprep.subr.mxu0 %v209_v5 }
  0x4b   :  { %1152 = vmatpush3.msra.mxu0 %v209_v5  ;;  %1146 = vmatprep.subr.mxu1 %v198_v25 }
  0x4c   :  { %1153 = vmatprep.subr.mxu0 %v208_v6  ;;  %1147 = vmatpush3.msra.mxu1 %v198_v25 }
  0x4d   :  { %1154 = vmatpush3.msra.mxu0 %v208_v6  ;;  %1178 = vmatprep.subr.mxu1 %v407_v37  ;;  %v506_v6 = vld [vmem:[#allocation7 + $0x50] sm:$0xff] }
  0x4e   :  { %1155 = vmatprep.subr.mxu0 %v207_v8 }
  0x4f   :  { %1156 = vmatpush3.msra.mxu0 %v207_v8  ;;  %v516_v8 = vld [vmem:[#allocation8 + $0x40] sm:$0xff] }
  0x50   :  { %1157 = vmatprep.subr.mxu0 %v206_v10 }
  0x51   :  { %1158 = vmatpush3.msra.mxu0 %v206_v10  ;;  %v515_v10 = vld [vmem:[#allocation8 + $0x38] sm:$0xff] }
  0x52   :  { %1159 = vmatprep.subr.mxu0 %v205_v12 }
  0x53   :  { %1160 = vmatpush3.msra.mxu0 %v205_v12  ;;  %v514_v12 = vld [vmem:[#allocation8 + $0x30] sm:$0xff] }
  0x54   :  { %1161 = vmatprep.subr.mxu0 %v204_v14 }
  0x55   :  { %1162 = vmatpush3.msra.mxu0 %v204_v14  ;;  %v513_v14 = vld [vmem:[#allocation8 + $0x28] sm:$0xff] }
  0x56   :  { %1163 = vmatprep.subr.mxu0 %v203_v16 }
  0x57   :  { %1164 = vmatpush3.msra.mxu0 %v203_v16  ;;  %v512_v16 = vld [vmem:[#allocation8 + $0x20] sm:$0xff] }
  0x58   :  { %1165 = vmatprep.subr.mxu0 %v202_v18 }
  0x59   :  { %1166 = vmatpush3.msra.mxu0 %v202_v18  ;;  %v511_v18 = vld [vmem:[#allocation8 + $0x18] sm:$0xff] }
  0x5a   :  { %1167 = vmatprep.subr.mxu0 %v201_v20 }
  0x5b   :  { %1168 = vmatpush3.msra.mxu0 %v201_v20  ;;  %v510_v20 = vld [vmem:[#allocation8 + $0x10] sm:$0xff] }
  0x5c   :  { %1169 = vmatprep.subr.mxu0 %v200_v23 }
  0x5d   :  { %1170 = vmatpush3.msra.mxu0 %v200_v23  ;;  %v509_v23 = vld [vmem:[#allocation8 + $0x8] sm:$0xff] }
  0x5e   :  { %1171 = vmatprep.subr.mxu0 %v199_v24 }
  0x5f   :  { %1172 = vmatpush3.msra.mxu0 %v199_v24  ;;  %v497_v24 = vld [vmem:[#allocation7 + $0x8] sm:$0xff] }
  0x60   :  { %1173 = vmatprep.subr.mxu0 %v198_v25 }
  0x61   :  { %1174 = vmatpush3.msra.mxu0 %v198_v25  ;;  %v508_v25 = vld [vmem:[#allocation8] sm:$0xff] }
  0x62   :  { %1205 = vmatprep.subr.mxu0 %v519_v49 }
 0x10a   :  { %v1123_v26 = vpop.f32.mrf.mxu0 }
 0x10b   :  { %v195_v30 = vadd.f32 %v1123_v26, %v964_v27  ;;  %v496_v26 = vld [vmem:[#allocation7] sm:$0xff] }
 0x10c   :  { %v189_v28 = vpop.f32.mrf.mxu0 }
 0x10d   :  { %v190_v29 = vadd.f32 %v964_v27, %v189_v28  ;;  %v712_v27 = vld [vmem:[%s1761_s8 + $0x58] sm:$0xff]  ;;  %v973_v28 = vld [vmem:[%s1760_s7] ss:$0 sm:$0xff] }
 0x10f   :  { %1148 = vmatprep.mubr.msk.f32.mxu1 %vm116_vm0, %v190_v29 }
 0x110   :  { %1149 = vmatmul.mubr.msk.f32.vlgmr.msra.gmra.mxu1 %vm116_vm0, %v195_v30 }
 0x111   :  { %1179 = vmatpush3.msra.mxu1 %v407_v37  ;;  %v709_v37 = vld [vmem:[%s1761_s8 + $0x40] sm:$0xff] }
 0x112   :  { %1180 = vmatprep.subr.mxu1 %v406_v38 }
 0x113   :  { %1181 = vmatpush3.msra.mxu1 %v406_v38  ;;  %v708_v38 = vld [vmem:[%s1761_s8 + $0x38] sm:$0xff] }
 0x114   :  { %1182 = vmatprep.subr.mxu1 %v405_v39 }
 0x115   :  { %1183 = vmatpush3.msra.mxu1 %v405_v39  ;;  %v707_v39 = vld [vmem:[%s1761_s8 + $0x30] sm:$0xff] }
 0x116   :  { %1184 = vmatprep.subr.mxu1 %v404_v40 }
 0x117   :  { %1185 = vmatpush3.msra.mxu1 %v404_v40  ;;  %v706_v40 = vld [vmem:[%s1761_s8 + $0x28] sm:$0xff] }
 0x118   :  { %1186 = vmatprep.subr.mxu1 %v403_v41 }
 0x119   :  { %1187 = vmatpush3.msra.mxu1 %v403_v41  ;;  %v705_v41 = vld [vmem:[%s1761_s8 + $0x20] sm:$0xff] }
 0x11a   :  { %1188 = vmatprep.subr.mxu1 %v402_v42 }
 0x11b   :  { %1189 = vmatpush3.msra.mxu1 %v402_v42  ;;  %v704_v42 = vld [vmem:[%s1761_s8 + $0x18] sm:$0xff] }
 0x11c   :  { %1190 = vmatprep.subr.mxu1 %v401_v43 }
 0x11d   :  { %1191 = vmatpush3.msra.mxu1 %v401_v43  ;;  %v703_v43 = vld [vmem:[%s1761_s8 + $0x10] sm:$0xff] }
 0x11e   :  { %1192 = vmatprep.subr.mxu1 %v400_v44 }
 0x11f   :  { %1193 = vmatpush3.msra.mxu1 %v400_v44  ;;  %v702_v44 = vld [vmem:[%s1761_s8 + $0x8] sm:$0xff] }
 0x120   :  { %1194 = vmatprep.subr.mxu1 %v399_v45 }
 0x121   :  { %1195 = vmatpush3.msra.mxu1 %v399_v45  ;;  %v701_v45 = vld [vmem:[%s1761_s8] sm:$0xff] }
 0x122   :  { %1196 = vmatprep.subr.mxu1 %v398_v46 }
 0x123   :  { %1197 = vmatpush3.msra.mxu1 %v398_v46 }
 0x124   :  { %1198 = vmatprep.subr.mxu1 %v397_v47 }
 0x125   :  { %1199 = vmatpush3.msra.mxu1 %v397_v47 }
 0x126   :  { %1200 = vmatprep.subr.mxu1 %v396_v48 }
 0x127   :  { %1201 = vmatpush3.msra.mxu1 %v396_v48  ;;  %v980_v48 = vld [vmem:[%s1760_s7 + $0x1] ss:$0 sm:$0xff] }
 0x128   :  { %1232 = vmatprep.subr.mxu1 %v507_v50 }
 0x1d0   :  { %v1150_v31 = vpop.f32.mrf.mxu1 }
 0x1d1   :  { %v292_v32 = vsub.f32 %v195_v30, %v1150_v31 }
 0x1d2   :  { %v282_v33 = vpop.f32.mrf.mxu1 }
 0x1d3   :  { %v291_v34 = vsub.f32 %v190_v29, %v282_v33  ;;  %v294_v36 = vmul.f32 %v292_v32, %v292_v32 }
 0x1d5   :  { %v293_v35 = vmul.f32 %v291_v34, %v291_v34 }
 0x1d7   :  { %1175 = vmatprep.mubr.msk.f32.mxu0 %vm116_vm0, %v293_v35  ;;  %v711_v35 = vld [vmem:[%s1761_s8 + $0x50] sm:$0xff] }
 0x1d8   :  { %1176 = vmatmul.mubr.msk.f32.vlgmr.msra.gmra.mxu0 %vm116_vm0, %v294_v36  ;;  %v710_v36 = vld [vmem:[%s1761_s8 + $0x48] sm:$0xff] }
 0x1d9   :  { %1206 = vmatpush3.msra.mxu0 %v519_v49 }
 0x1da   :  { %1207 = vmatprep.subr.mxu0 %v518_v51 }
 0x1db   :  { %1208 = vmatpush3.msra.mxu0 %v518_v51 }
 0x1dc   :  { %1209 = vmatprep.subr.mxu0 %v517_v52 }
 0x1dd   :  { %1210 = vmatpush3.msra.mxu0 %v517_v52 }
 0x1de   :  { %1211 = vmatprep.subr.mxu0 %v516_v8 }
 0x1df   :  { %1212 = vmatpush3.msra.mxu0 %v516_v8 }
 0x1e0   :  { %1213 = vmatprep.subr.mxu0 %v515_v10 }
 0x1e1   :  { %1214 = vmatpush3.msra.mxu0 %v515_v10 }
 0x1e2   :  { %1215 = vmatprep.subr.mxu0 %v514_v12 }
 0x1e3   :  { %1216 = vmatpush3.msra.mxu0 %v514_v12 }
 0x1e4   :  { %1217 = vmatprep.subr.mxu0 %v513_v14 }
 0x1e5   :  { %1218 = vmatpush3.msra.mxu0 %v513_v14 }
 0x1e6   :  { %1219 = vmatprep.subr.mxu0 %v512_v16 }
 0x1e7   :  { %1220 = vmatpush3.msra.mxu0 %v512_v16 }
 0x1e8   :  { %1221 = vmatprep.subr.mxu0 %v511_v18 }
 0x1e9   :  { %1222 = vmatpush3.msra.mxu0 %v511_v18 }
 0x1ea   :  { %1223 = vmatprep.subr.mxu0 %v510_v20 }
 0x1eb   :  { %1224 = vmatpush3.msra.mxu0 %v510_v20 }
 0x1ec   :  { %1225 = vmatprep.subr.mxu0 %v509_v23 }
 0x1ed   :  { %1226 = vmatpush3.msra.mxu0 %v509_v23 }
 0x1ee   :  { %1227 = vmatprep.subr.mxu0 %v508_v25 }
 0x1ef   :  { %1228 = vmatpush3.msra.mxu0 %v508_v25  ;;  %v843_v25 = vld [vmem:[%s1763_s10 + $0x30] sm:$0xff] }
 0x1f0   :  { %1259 = vmatprep.subr.mxu0 %v712_v27 }
 0x298   :  { %v1177_v53 = vpop.f32.mrf.mxu0 }
 0x299   :  { %v373_v54 = vadd.f32 1e-05, %v1177_v53 }
 0x29a   :  { %v367_v55 = vpop.f32.mrf.mxu0 }
 0x29b   :  { %1313 = vrsqrt.f32 %v373_v54  ;;  %v368_v56 = vadd.f32 1e-05, %v367_v55 }
 0x29d   :  { %1315 = vrsqrt.f32 %v368_v56 }
 0x2a8   :  { %v1314_v57 = vpop.eup %1313 }
 0x2a9   :  { %v379_v59 = vmul.f32 %v1314_v57, %v292_v32 }
 0x2aa   :  { %v1316_v60 = vpop.eup %1315 }
 0x2ab   :  { %v378_v61 = vmul.f32 %v1316_v60, %v291_v34  ;;  %v386_v62 = vmul.f32 %v971_v58, %v379_v59 }
 0x2ad   :  { %v385_v0 = vmul.f32 %v971_v58, %v378_v61  ;;  %v393_v1 = vadd.f32 %v972_v63, %v386_v62 }
 0x2af   :  { %v392_v2 = vadd.f32 %v972_v63, %v385_v0  ;;  %v395_v5 = vmax.f32 %v393_v1, 0.0  ;;  %v981_v0 = vld [vmem:[%s1762_s9] ss:$0 sm:$0xff] }
 0x2b1   :  { %v394_v3 = vmax.f32 %v392_v2, 0.0 }
 0x2b3   :  { %1202 = vmatprep.mubr.msk.f32.mxu1 %vm116_vm0, %v394_v3 }
 0x2b4   :  { %1203 = vmatmul.mubr.msk.f32.vlgmr.msra.gmra.mxu1 %vm116_vm0, %v395_v5 }
 0x2b5   :  { %1233 = vmatpush3.msra.mxu1 %v507_v50  ;;  %1256 = vmatprep.mubr.msk.f32.mxu1 %vm116_vm0, %v1550_v4 }
 0x2b6   :  { %1234 = vmatprep.subr.mxu1 %v506_v6 }
 0x2b7   :  { %1235 = vmatpush3.msra.mxu1 %v506_v6 }
 0x2b8   :  { %1236 = vmatprep.subr.mxu1 %v505_v7 }
 0x2b9   :  { %1237 = vmatpush3.msra.mxu1 %v505_v7 }
 0x2ba   :  { %1238 = vmatprep.subr.mxu1 %v504_v9 }
 0x2bb   :  { %1239 = vmatpush3.msra.mxu1 %v504_v9 }
 0x2bc   :  { %1240 = vmatprep.subr.mxu1 %v503_v11 }
 0x2bd   :  { %1241 = vmatpush3.msra.mxu1 %v503_v11 }
 0x2be   :  { %1242 = vmatprep.subr.mxu1 %v502_v13 }
 0x2bf   :  { %1243 = vmatpush3.msra.mxu1 %v502_v13 }
 0x2c0   :  { %1244 = vmatprep.subr.mxu1 %v501_v15 }
 0x2c1   :  { %1245 = vmatpush3.msra.mxu1 %v501_v15 }
 0x2c2   :  { %1246 = vmatprep.subr.mxu1 %v500_v17 }
 0x2c3   :  { %1247 = vmatpush3.msra.mxu1 %v500_v17 }
 0x2c4   :  { %1248 = vmatprep.subr.mxu1 %v499_v19 }
 0x2c5   :  { %1249 = vmatpush3.msra.mxu1 %v499_v19 }
 0x2c6   :  { %1250 = vmatprep.subr.mxu1 %v498_v21 }
 0x2c7   :  { %1251 = vmatpush3.msra.mxu1 %v498_v21 }
 0x2c8   :  { %1252 = vmatprep.subr.mxu1 %v497_v24 }
 0x2c9   :  { %1253 = vmatpush3.msra.mxu1 %v497_v24  ;;  %v844_v24 = vld [vmem:[%s1763_s10 + $0x38] sm:$0xff] }
 0x2ca   :  { %1254 = vmatprep.subr.mxu1 %v496_v26 }
 0x2cb   :  { %1255 = vmatpush3.msra.mxu1 %v496_v26  ;;  %v842_v26 = vld [vmem:[%s1763_s10 + $0x28] sm:$0xff] }
 0x2cc   :  { %1257 = vmatmul.mubr.msk.f32.vlgmr.msra.gmra.mxu1 %vm116_vm0, %v1605_v22  ;;  %1286 = vmatprep.subr.mxu1 %v844_v24 }
 0x2cd   :  { %1287 = vmatpush3.msra.mxu1 %v844_v24 }
 0x2ce   :  { %1288 = vmatprep.subr.mxu1 %v843_v25 }
 0x2cf   :  { %1289 = vmatpush3.msra.mxu1 %v843_v25 }
 0x2d0   :  { %1290 = vmatprep.subr.mxu1 %v842_v26 }
 0x2d1   :  { %1291 = vmatpush3.msra.mxu1 %v842_v26 }
 0x374   :  { %v1204_v29 = vpop.f32.mrf.mxu1 }
 0x375   :  { %v491_v30 = vadd.f32 %v1204_v29, %v973_v28  ;;  %v839_v29 = vld [vmem:[%s1763_s10 + $0x10] sm:$0xff] }
 0x376   :  { %v485_v31 = vpop.f32.mrf.mxu1 }
 0x377   :  { %v486_v32 = vadd.f32 %v973_v28, %v485_v31  ;;  %v840_v28 = vld [vmem:[%s1763_s10 + $0x18] sm:$0xff]  ;;  %v837_v31 = vld [vmem:[%s1763_s10] sm:$0xff] }
 0x379   :  { %1317 = vtanh.f32 %v486_v32 }
 0x37a   :  { %1319 = vtanh.f32 %v491_v30  ;;  %v838_v30 = vld [vmem:[%s1763_s10 + $0x8] sm:$0xff] }
 0x386   :  { %v1643_v33 = vpop.eup %1317 }
 0x387   :  { %v1645_v34 = vpop.eup %1319  ;;  %1229 = vmatprep.mubr.msk.f32.mxu0 %vm116_vm0, %v1643_v33  ;;  %v695_v10 = vsub.f32 %v1643_v33, %v1550_v4 }
 0x388   :  { %1230 = vmatmul.mubr.msk.f32.vlgmr.msra.gmra.mxu0 %vm116_vm0, %v1645_v34  ;;  %v696_v7 = vsub.f32 %v1645_v34, %v1605_v22 }
 0x389   :  { %1260 = vmatpush3.msra.mxu0 %v712_v27  ;;  %1283 = vmatprep.mubr.msk.f32.mxu0 %vm116_vm0, %v1550_v4  ;;  %v841_v27 = vld [vmem:[%s1763_s10 + $0x20] sm:$0xff] }
 0x38a   :  { %1261 = vmatprep.subr.mxu0 %v711_v35  ;;  %1292 = vmatprep.subr.mxu1 %v841_v27 }
 0x38b   :  { %1262 = vmatpush3.msra.mxu0 %v711_v35  ;;  %1293 = vmatpush3.msra.mxu1 %v841_v27 }
 0x38c   :  { %1263 = vmatprep.subr.mxu0 %v710_v36  ;;  %v1258_v46 = vpop.f32.mrf.mxu1  ;;  %1294 = vmatprep.subr.mxu1 %v840_v28 }
 0x38d   :  { %1264 = vmatpush3.msra.mxu0 %v710_v36  ;;  %1295 = vmatpush3.msra.mxu1 %v840_v28 }
 0x38e   :  { %1265 = vmatprep.subr.mxu0 %v709_v37  ;;  %v667_v49 = vpop.f32.mrf.mxu1  ;;  %1296 = vmatprep.subr.mxu1 %v839_v29 }
 0x38f   :  { %1266 = vmatpush3.msra.mxu0 %v709_v37  ;;  %1297 = vmatpush3.msra.mxu1 %v839_v29 }
 0x390   :  { %1267 = vmatprep.subr.mxu0 %v708_v38  ;;  %1298 = vmatprep.subr.mxu1 %v838_v30 }
 0x391   :  { %1268 = vmatpush3.msra.mxu0 %v708_v38  ;;  %1299 = vmatpush3.msra.mxu1 %v838_v30 }
 0x392   :  { %1269 = vmatprep.subr.mxu0 %v707_v39  ;;  %1300 = vmatprep.subr.mxu1 %v837_v31 }
 0x393   :  { %1270 = vmatpush3.msra.mxu0 %v707_v39  ;;  %1301 = vmatpush3.msra.mxu1 %v837_v31  ;;  %v984_v39 = vld [vmem:[%s1762_s9 + $0x1] ss:$0 sm:$0xff] }
 0x394   :  { %1271 = vmatprep.subr.mxu0 %v706_v40 }
 0x395   :  { %1272 = vmatpush3.msra.mxu0 %v706_v40 }
 0x396   :  { %1273 = vmatprep.subr.mxu0 %v705_v41 }
 0x397   :  { %1274 = vmatpush3.msra.mxu0 %v705_v41  ;;  %v985_v41 = vld [vmem:[%s1762_s9 + $0x2] ss:$0 sm:$0xff]  ;;  %s1447_s9 = smov 96  }
 0x398   :  { %1275 = vmatprep.subr.mxu0 %v704_v42 }
 0x399   :  { %1276 = vmatpush3.msra.mxu0 %v704_v42 }
 0x39a   :  { %1277 = vmatprep.subr.mxu0 %v703_v43 }
 0x39b   :  { %1278 = vmatpush3.msra.mxu0 %v703_v43 }
 0x39c   :  { %1279 = vmatprep.subr.mxu0 %v702_v44 }
 0x39d   :  { %1280 = vmatpush3.msra.mxu0 %v702_v44 }
 0x39e   :  { %1281 = vmatprep.subr.mxu0 %v701_v45 }
 0x39f   :  { %1282 = vmatpush3.msra.mxu0 %v701_v45 }
 0x3a0   :  { %1284 = vmatmul.mubr.msk.f32.vlgmr.msra.gmra.mxu0 %vm116_vm0, %v1605_v22 }
 0x448   :  { %v1231_v47 = vpop.f32.mrf.mxu0 }
 0x449   :  { %v673_v50 = vadd.f32 %v1258_v46, %v1231_v47 }
 0x44a   :  { %v592_v51 = vpop.f32.mrf.mxu0 }
 0x44b   :  { %v682_v52 = vadd.f32 %v980_v48, %v673_v50  ;;  %v668_v53 = vadd.f32 %v667_v49, %v592_v51  ;;  %v986_v50 = vld [vmem:[%s1764_s11] ss:$0 sm:$0xff]  ;;  %s1413_s11 = scalar_lea.vmem %s951_s19, 256 }
 0x44c   :  { %p1414_p6 = scmp.ne.s32.totalorder %s951_s19, %s1413_s11  ;;  %p1419_p8 = scmp.lt.s32.totalorder %s1413_s11, %s1413_s11 }
 0x44d   :  { %v684_v54 = vsub.f32 0.0, %v682_v52  ;;  %v681_v55 = vadd.f32 %v980_v48, %v668_v53 }
 0x44e   :  { %p1420_p9 = por %p1419_p8, %p1418_p7 }
 0x44f   :  { %v687_v56 = vmul.f32 1.442695, %v684_v54  ;;  %v683_v57 = vsub.f32 0.0, %v681_v55 }
 0x450   :  { %p1421_p10 = pnand %p1420_p9, %p1414_p6 }
 0x451   :  { %1321 = vpow2.f32 %v687_v56  ;;  %v685_v58 = vmul.f32 1.442695, %v683_v57 }
 0x453   :  { %1323 = vpow2.f32 %v685_v58 }
 0x45e   :  { %v1322_v59 = vpop.eup %1321 }
 0x45f   :  { %v690_v60 = vadd.f32 1.0, %v1322_v59 }
 0x460   :  { %v1324_v61 = vpop.eup %1323  ;;  %v1285_v62 = vpop.f32.mrf.mxu0 }
 0x461   :  { %1325 = vrcp.f32 %v690_v60  ;;  %v689_v63 = vadd.f32 1.0, %v1324_v61  ;;  %v790_v3 = vadd.f32 %v1285_v62, %v981_v0 }
 0x462   :  { %v784_v1 = vpop.f32.mrf.mxu0 }
 0x463   :  { %1327 = vrcp.f32 %v689_v63  ;;  %v785_v2 = vadd.f32 %v981_v0, %v784_v1  ;;  %v797_v6 = vsel %vm793_vm1, %v790_v3, 0.0 }
 0x465   :  { %v794_v5 = vsel %vm793_vm1, %v785_v2, 0.0 }
 0x466   :  { %795 = vadd.xlane.f32.xlu0 %v794_v5 }
 0x46a   :  { %798 = vadd.xlane.f32.xlu0 %v797_v6 }
 0x46e   :  { %v1326_v8 = vpop.eup %1325 }
 0x46f   :  { %v1698_v9 = vmul.f32 %v1326_v8, %v696_v7 }
 0x470   :  { %v1328_v11 = vpop.eup %1327 }
 0x471   :  { %v1702_v12 = vmul.f32 %v1328_v11, %v695_v10  ;;  %v700_v55 = vadd.f32 %v1698_v9, %v1605_v22 }
 0x473   :  { %v699_v58 = vadd.f32 %v1702_v12, %v1550_v4 }
 0x4ef   :  { %v796_v13 = vpop.xlane.xlu0 %795 }
 0x4f0   :  { %v801_v14 = vmul.f32 0.015625, %v796_v13 }
 0x4f2   :  { %v803_v15 = vsub.f32 %v785_v2, %v801_v14 }
 0x4f3   :  { %v799_v16 = vpop.xlane.xlu0 %798 }
 0x4f4   :  { %v802_v17 = vmul.f32 0.015625, %v799_v16  ;;  %v805_v18 = vmul.f32 %v803_v15, %v803_v15 }
 0x4f6   :  { %v804_v19 = vsub.f32 %v790_v3, %v802_v17  ;;  %v807_v20 = vsel %vm793_vm1, %v805_v18, 0.0 }
 0x4f7   :  { %808 = vadd.xlane.f32.xlu1 %v807_v20 }
 0x4f8   :  { %v806_v21 = vmul.f32 %v804_v19, %v804_v19 }
 0x4fa   :  { %v810_v23 = vsel %vm793_vm1, %v806_v21, 0.0 }
 0x4fb   :  { %811 = vadd.xlane.f32.xlu1 %v810_v23 }
 0x580   :  { %v809_v32 = vpop.xlane.xlu1 %808 }
 0x581   :  { %v813_v33 = vmul.f32 0.015625, %v809_v32 }
 0x583   :  { %v815_v34 = vadd.f32 1e-05, %v813_v33 }
 0x584   :  { %v812_v35 = vpop.xlane.xlu1 %811 }
 0x585   :  { %1329 = vrsqrt.f32 %v815_v34  ;;  %v814_v36 = vmul.f32 0.015625, %v812_v35 }
 0x587   :  { %v816_v37 = vadd.f32 1e-05, %v814_v36 }
 0x589   :  { %1331 = vrsqrt.f32 %v816_v37 }
 0x592   :  { %v1330_v38 = vpop.eup %1329 }
 0x593   :  { %v819_v40 = vmul.f32 %v1330_v38, %v803_v15 }
 0x595   :  { %v826_v42 = vmul.f32 %v984_v39, %v819_v40 }
 0x596   :  { %v1332_v43 = vpop.eup %1331 }
 0x597   :  { %v820_v44 = vmul.f32 %v1332_v43, %v804_v19  ;;  %v833_v45 = vadd.f32 %v985_v41, %v826_v42 }
 0x599   :  { %v827_v46 = vmul.f32 %v984_v39, %v820_v44  ;;  %v835_v47 = vmax.f32 %v833_v45, 0.0 }
 0x59b   :  { %v834_v48 = vadd.f32 %v985_v41, %v827_v46  ;;  %1302 = vmatprep.mubr.msk.f32.mxu1 %vm793_vm1, %v835_v47 }
 0x59d   :  { %v836_v49 = vmax.f32 %v834_v48, 0.0 }
 0x59f   :  { %1303 = vmatmul.mubr.msk.f32.vlgmr.msra.gmra.mxu1 %vm793_vm1, %v836_v49 }
 0x65f   :  { %v1304_v51 = vpop.f32.mrf.mxu1 }
 0x660   :  { %v930_v52 = vadd.f32 %v1304_v51, %v986_v50 }
 0x661   :  { %v924_v53 = vpop.f32.mrf.mxu1 }
 0x662   :  { %v925_v54 = vadd.f32 %v986_v50, %v924_v53  ;;  %937 = vrot.lane.b32.xlu1 %v930_v52, %s1447_s9 }
 0x664   :  { %935 = vrot.lane.b32.xlu0 %v925_v54, %s1447_s9 }
 0x6d4   :  { %v938_v56 = vpop.permute.xlu1 %937 }
 0x6d5   :  { %v942_v57 = vsel %vm116_vm0, %v700_v55, %v938_v56 }
 0x6d6   :  { %944 = vst [vmem:[#allocation10 + $0x8] sm:$0xff] %v942_v57  ;;  %v936_v59 = vpop.permute.xlu0 %935 }
 0x6d7   :  { %v941_v60 = vsel %vm116_vm0, %v699_v58, %v936_v59 }
 0x6d8   :  { %943 = vst [vmem:[#allocation10] sm:$0xff] %v941_v60 }
 0x6d9   :  { %1424 = shalt.err (!%p1421_p10)
}
 0x6da   :  { %956 = dma.vmem_to_hbm [thread:$0]  %s951_s19, 256, %s1765_s12, [#allocation4], %s1443_s26, %s1443_s26, %s1444_s27  }
 0x6db   :  { %1439 = dma.done.wait [#allocation4], 256  }
 0x6dc   :  { %1440 = vsyncadd [#allocation4], 4294967040 }
 0x6dd   :  { %960 = vsyncpa [#allocation3], 1 }
 0x6de   :  { %961 = vsyncpa [#allocation6], 1 }
 0x6df   :  { %962 = vsyncpa [#allocation9], 1 }
 0x6e0   :  { %963 = vsyncpa [#allocation4], 1 }

</bundles_post_ra>
